<compile_context>
chip_gen: v6e
topology: v6e:2x2x1
jax: 0.10.0
libtpu: 0.0.40
codegen_flags: <defaults>
</compile_context>

<pallas_src>
import functools

import jax
import jax.numpy as jnp
from jax import lax
from jax.experimental import pallas as pl
from jax.experimental.pallas import tpu as pltpu

MXU_DTYPE = jnp.bfloat16     # matmul operand dtype (f32 accumulation on the MXU)
BN_EPS = 1e-5


def _ceil_to(x, m):
    return ((x + m - 1) // m) * m


# ------------------------- tiled matmul + bias (MXU) -------------------------
# Used for the 1x1 projection shortcut.

def _matmul_bias_kernel(x_ref, w_ref, b_ref, o_ref, acc_ref):
    @pl.when(pl.program_id(2) == 0)
    def _():
        acc_ref[...] = jnp.zeros_like(acc_ref)

    acc_ref[...] += jnp.dot(x_ref[...], w_ref[...],
                            preferred_element_type=jnp.float32)

    @pl.when(pl.program_id(2) == pl.num_programs(2) - 1)
    def _():
        o_ref[...] = (acc_ref[...] + b_ref[...]).astype(o_ref.dtype)


def pallas_matmul_bias(x, w, b, *, tm=256, tn=256, tk=512):
    M, K = x.shape
    N = w.shape[1]
    x = x.astype(MXU_DTYPE)
    w = w.astype(MXU_DTYPE)
    b2 = b.reshape(1, N).astype(jnp.float32)

    tm = M if M <= tm else tm
    tn = N if N <= tn else tn
    tk = K if K <= tk else tk
    Mp, Np, Kp = _ceil_to(M, tm), _ceil_to(N, tn), _ceil_to(K, tk)
    if (Mp, Kp) != (M, K):
        x = jnp.pad(x, ((0, Mp - M), (0, Kp - K)))
    if (Kp, Np) != (K, N):
        w = jnp.pad(w, ((0, Kp - K), (0, Np - N)))
    if Np != N:
        b2 = jnp.pad(b2, ((0, 0), (0, Np - N)))

    out = pl.pallas_call(
        _matmul_bias_kernel,
        out_shape=jax.ShapeDtypeStruct((Mp, Np), jnp.float32),
        grid=(Mp // tm, Np // tn, Kp // tk),
        in_specs=[
            pl.BlockSpec((tm, tk), lambda i, j, k: (i, k)),
            pl.BlockSpec((tk, tn), lambda i, j, k: (k, j)),
            pl.BlockSpec((1, tn), lambda i, j, k: (0, j)),   # bias tracks the N tile
        ],
        out_specs=pl.BlockSpec((tm, tn), lambda i, j, k: (i, j)),
        scratch_shapes=[pltpu.VMEM((tm, tn), jnp.float32)],
        compiler_params=pltpu.CompilerParams(
            dimension_semantics=("parallel", "parallel", "arbitrary")),
        cost_estimate=pl.CostEstimate(
            flops=2 * Mp * Np * Kp, transcendentals=0,
            bytes_accessed=(Mp * Kp + Kp * Np) * 2 + Mp * Np * 4),
    )(x, w, b2)
    if (Mp, Np) != (M, N):
        out = out[:M, :N]
    return out


# ------------------------------ 3x3 convolution ------------------------------
# The kernel sees one phase-decomposed, spatially padded image and one Cout tile;
# it accumulates nine shifted (Cin, Cout) matmuls in an f32 register accumulator.

def _conv3x3_kernel(x_ref, w_ref, b_ref, o_ref, *, stride, out_h, out_w):
    # x_ref: (1, s*s, Hq, Wq, Cin)  bf16   w_ref: (3,3,Cin,tCout) bf16
    # b_ref: (1, tCout) f32               o_ref: (1, out_h, out_w, tCout) f32
    s = stride
    cin = x_ref.shape[-1]
    tcout = o_ref.shape[-1]
    acc = jnp.zeros((out_h * out_w, tcout), jnp.float32)
    for kh in range(3):
        for kw in range(3):
            phase = (kh % s) * s + (kw % s)
            i0, j0 = kh // s, kw // s
            tap = x_ref[0, phase, i0:i0 + out_h, j0:j0 + out_w, :]
            tap = tap.reshape(out_h * out_w, cin)
            acc += jnp.dot(tap, w_ref[kh, kw],
                           preferred_element_type=jnp.float32)
    out = (acc + b_ref[...]).reshape(1, out_h, out_w, tcout)
    o_ref[...] = out.astype(o_ref.dtype)


def conv3x3(x_nhwc, w, b, stride):
    # x_nhwc: (N,H,W,Cin) f32, w: (3,3,Cin,Cout), b: (Cout,); padding=1
    N, H, W, Cin = x_nhwc.shape
    Cout = w.shape[-1]
    s = stride
    Ho = (H + 2 - 3) // s + 1
    Wo = (W + 2 - 3) // s + 1

    xp = jnp.pad(x_nhwc, ((0, 0), (1, 1), (1, 1), (0, 0)))
    Hp, Wp = H + 2, W + 2
    Hq, Wq = -(-Hp // s), -(-Wp // s)
    # every tap slice must stay inside the valid rows/cols of its phase
    for k in range(3):
        assert k // s + Ho <= -(-(Hp - k % s) // s)
        assert k // s + Wo <= -(-(Wp - k % s) // s)
    if (Hq * s, Wq * s) != (Hp, Wp):
        xp = jnp.pad(xp, ((0, 0), (0, Hq * s - Hp), (0, Wq * s - Wp), (0, 0)))
    # phases[n, a*s + b, i, j, c] == xp[n, s*i + a, s*j + b, c]
    x5 = (xp.reshape(N, Hq, s, Wq, s, Cin)
            .transpose(0, 2, 4, 1, 3, 5)
            .reshape(N, s * s, Hq, Wq, Cin)
            .astype(MXU_DTYPE))
    wc = w.astype(MXU_DTYPE)
    b2 = b.reshape(1, Cout).astype(jnp.float32)

    tco = Cout if Cout <= 256 else 256
    Cop = _ceil_to(Cout, tco)
    if Cop != Cout:
        wc = jnp.pad(wc, ((0, 0), (0, 0), (0, 0), (0, Cop - Cout)))
        b2 = jnp.pad(b2, ((0, 0), (0, Cop - Cout)))

    kern = functools.partial(_conv3x3_kernel, stride=s, out_h=Ho, out_w=Wo)
    out = pl.pallas_call(
        kern,
        out_shape=jax.ShapeDtypeStruct((N, Ho, Wo, Cop), jnp.float32),
        grid=(N, Cop // tco),
        in_specs=[
            pl.BlockSpec((1, s * s, Hq, Wq, Cin), lambda n, j: (n, 0, 0, 0, 0)),
            pl.BlockSpec((3, 3, Cin, tco), lambda n, j: (0, 0, 0, j)),
            pl.BlockSpec((1, tco), lambda n, j: (0, j)),
        ],
        out_specs=pl.BlockSpec((1, Ho, Wo, tco), lambda n, j: (n, 0, 0, j)),
        compiler_params=pltpu.CompilerParams(
            dimension_semantics=("parallel", "parallel")),
        cost_estimate=pl.CostEstimate(
            flops=2 * N * Ho * Wo * Cop * 9 * Cin, transcendentals=0,
            bytes_accessed=(N * s * s * Hq * Wq * Cin + 9 * Cin * Cop) * 2
                           + N * Ho * Wo * Cop * 4),
    )(x5, wc, b2)
    if Cop != Cout:
        out = out[..., :Cout]
    return out


# ----------------------- BatchNorm (training-mode stats) ---------------------
# Pass 1: tiled per-channel sum / sum-of-squares reduction over M = N*H*W.

def _bn_stats_kernel(x_ref, o_ref):
    @pl.when(pl.program_id(0) == 0)
    def _():
        o_ref[...] = jnp.zeros_like(o_ref)
    x = x_ref[...]
    o_ref[0:1, :] += jnp.sum(x, axis=0, keepdims=True)
    o_ref[1:2, :] += jnp.sum(x * x, axis=0, keepdims=True)


def pallas_bn_stats(x2d, *, tm=1024):
    M, C = x2d.shape
    tm = M if M <= tm else tm
    Mp = _ceil_to(M, tm)
    if Mp != M:
        x2d = jnp.pad(x2d, ((0, Mp - M), (0, 0)))   # zero rows: no effect on sums
    return pl.pallas_call(
        _bn_stats_kernel,
        out_shape=jax.ShapeDtypeStruct((2, C), jnp.float32),
        grid=(Mp // tm,),
        in_specs=[pl.BlockSpec((tm, C), lambda i: (i, 0))],
        out_specs=pl.BlockSpec((2, C), lambda i: (0, 0)),
        compiler_params=pltpu.CompilerParams(dimension_semantics=("arbitrary",)),
    )(x2d)


# Pass 2: fused normalize (+ ReLU / residual add / shortcut BN) -> one HBM trip.

def _bn_normalize(x, stats, gamma, beta, count):
    mean = stats[0:1, :] / count
    var = stats[1:2, :] / count - mean * mean        # biased variance (train mode)
    inv = lax.rsqrt(var + BN_EPS)                    # EUP rsqrt
    return (x - mean) * (inv * gamma) + beta


def _bn_relu_kernel(x_ref, st_ref, g_ref, b_ref, o_ref, *, count):
    # relu(bn(x))
    y = _bn_normalize(x_ref[...], st_ref[...], g_ref[...], b_ref[...], count)
    o_ref[...] = jnp.maximum(y, 0.0)


def _bn_add_relu_kernel(x_ref, st_ref, g_ref, b_ref, r_ref, o_ref, *, count):
    # relu(relu(bn(x)) + r)      -- identity-shortcut tail
    y = jnp.maximum(
        _bn_normalize(x_ref[...], st_ref[...], g_ref[...], b_ref[...], count), 0.0)
    o_ref[...] = jnp.maximum(y + r_ref[...], 0.0)


def _bn_bn_add_relu_kernel(x_ref, st_ref, g_ref, b_ref,
                           r_ref, str_ref, gr_ref, br_ref, o_ref, *, count):
    # relu(relu(bn(x)) + bn(r))  -- projection-shortcut tail
    y = jnp.maximum(
        _bn_normalize(x_ref[...], st_ref[...], g_ref[...], b_ref[...], count), 0.0)
    z = _bn_normalize(r_ref[...], str_ref[...], gr_ref[...], br_ref[...], count)
    o_ref[...] = jnp.maximum(y + z, 0.0)


def pallas_bn_tail(x2d, stats, gamma, beta, residual=None, res_params=None, *, tm=1024):
    """Fused BatchNorm tail over an (M, C) activation."""
    M, C = x2d.shape
    tm = M if M <= tm else tm
    Mp = _ceil_to(M, tm)

    def pad_rows(a):
        return jnp.pad(a, ((0, Mp - M), (0, 0))) if Mp != M else a

    row_spec = pl.BlockSpec((tm, C), lambda i: (i, 0))
    st_spec = pl.BlockSpec((2, C), lambda i: (0, 0))
    vec_spec = pl.BlockSpec((1, C), lambda i: (0, 0))

    args = [pad_rows(x2d), stats, gamma.reshape(1, C), beta.reshape(1, C)]
    specs = [row_spec, st_spec, vec_spec, vec_spec]
    if residual is None:
        kern = functools.partial(_bn_relu_kernel, count=float(M))
    elif res_params is None:
        kern = functools.partial(_bn_add_relu_kernel, count=float(M))
        args.append(pad_rows(residual))
        specs.append(row_spec)
    else:
        st_r, g_r, b_r = res_params
        kern = functools.partial(_bn_bn_add_relu_kernel, count=float(M))
        args += [pad_rows(residual), st_r, g_r.reshape(1, C), b_r.reshape(1, C)]
        specs += [row_spec, st_spec, vec_spec, vec_spec]

    out = pl.pallas_call(
        kern,
        out_shape=jax.ShapeDtypeStruct((Mp, C), jnp.float32),
        grid=(Mp // tm,),
        in_specs=specs,
        out_specs=row_spec,
        compiler_params=pltpu.CompilerParams(dimension_semantics=("parallel",)),
    )(*args)
    return out[:M] if Mp != M else out


# ------------------------------ similarity matrix ----------------------------
# sim = x_s @ x_s.T / D with per-row standardization (torch.std -> unbiased).
# D-tiled Gram + row-moment accumulation; only a (B, tD) slab is resident.

def _sim_kernel(x_ref, o_ref, g_acc, s_acc, q_acc, *, d_total):
    @pl.when(pl.program_id(0) == 0)
    def _():
        g_acc[...] = jnp.zeros_like(g_acc)
        s_acc[...] = jnp.zeros_like(s_acc)
        q_acc[...] = jnp.zeros_like(q_acc)

    x = x_ref[...]
    # Gram tile: contract the D axis of both operands (no materialized x.T).
    g_acc[...] += lax.dot_general(x, x, (((1,), (1,)), ((), ())),
                                  preferred_element_type=jnp.float32)
    s_acc[...] += jnp.sum(x, axis=1, keepdims=True)
    q_acc[...] += jnp.sum(x * x, axis=1, keepdims=True)

    @pl.when(pl.program_id(0) == pl.num_programs(0) - 1)
    def _():
        d = jnp.float32(d_total)
        g = g_acc[...]
        s = s_acc[...]
        q = q_acc[...]
        # torch.std default is unbiased (d-1); no epsilon, matching the PyTorch
        # reference (an exactly-constant row gives inf/nan there as well).
        inv_std = lax.rsqrt((q - s * s / d) / (d - 1.0))
        ss = lax.dot_general(s, s, (((1,), (1,)), ((), ())),
                             preferred_element_type=jnp.float32)        # s s^T
        ii = lax.dot_general(inv_std, inv_std, (((1,), (1,)), ((), ())),
                             preferred_element_type=jnp.float32)        # 1/(sig_i sig_j)
        o_ref[...] = (g - ss / d) * ii / d


def pallas_similarity(x2d, *, td=2048):
    B, D = x2d.shape
    td = D if D <= td else td
    Dp = _ceil_to(D, td)
    if Dp != D:
        x2d = jnp.pad(x2d, ((0, 0), (0, Dp - D)))   # zero cols: no effect on G/s/q
    kern = functools.partial(_sim_kernel, d_total=D)
    return pl.pallas_call(
        kern,
        out_shape=jax.ShapeDtypeStruct((B, B), jnp.float32),
        grid=(Dp // td,),
        in_specs=[pl.BlockSpec((B, td), lambda i: (0, i))],
        out_specs=pl.BlockSpec((B, B), lambda i: (0, 0)),
        scratch_shapes=[pltpu.VMEM((B, B), jnp.float32),
                        pltpu.VMEM((B, 1), jnp.float32),
                        pltpu.VMEM((B, 1), jnp.float32)],
        compiler_params=pltpu.CompilerParams(dimension_semantics=("arbitrary",)),
    )(x2d)


# ----------------------------- BasicBlock forward ----------------------------

def init_basic_block_params(key, in_planes, planes, stride):
    ks = jax.random.split(key, 6)
    params = {
        "conv1_w": jax.random.normal(ks[0], (3, 3, in_planes, planes), jnp.float32) * 0.1,
        "conv1_b": jax.random.normal(ks[1], (planes,), jnp.float32) * 0.01,
        "bn1_gamma": jnp.ones((planes,), jnp.float32),
        "bn1_beta": jnp.zeros((planes,), jnp.float32),
        "conv2_w": jax.random.normal(ks[2], (3, 3, planes, planes), jnp.float32) * 0.1,
        "conv2_b": jax.random.normal(ks[3], (planes,), jnp.float32) * 0.01,
        "bn2_gamma": jnp.ones((planes,), jnp.float32),
        "bn2_beta": jnp.zeros((planes,), jnp.float32),
        "stride": stride,
        "has_shortcut": (stride != 1 or in_planes != planes),
    }
    if params["has_shortcut"]:
        params["sc_w"] = jax.random.normal(ks[4], (in_planes, planes), jnp.float32) * 0.1
        params["sc_b"] = jax.random.normal(ks[5], (planes,), jnp.float32) * 0.01
        params["sc_gamma"] = jnp.ones((planes,), jnp.float32)
        params["sc_beta"] = jnp.zeros((planes,), jnp.float32)
    return params


def basic_block_forward(params, xs):
    x_nchw, S = xs
    x = jnp.transpose(x_nchw, (0, 2, 3, 1)).astype(jnp.float32)   # NCHW -> NHWC
    stride = params["stride"]
    N = x.shape[0]

    # out = conv1(x); s1 = sim(out); out = relu(bn1(out))
    out = conv3x3(x, params["conv1_w"], params["conv1_b"], stride)
    _, Ho, Wo, C = out.shape
    M = N * Ho * Wo
    s1 = pallas_similarity(out.reshape(N, -1))
    out2d = out.reshape(M, C)
    st1 = pallas_bn_stats(out2d)
    out = pallas_bn_tail(out2d, st1, params["bn1_gamma"],
                         params["bn1_beta"]).reshape(N, Ho, Wo, C)

    # out = conv2(out); s2 = sim(out); (bn2+relu fused into the residual tail)
    out = conv3x3(out, params["conv2_w"], params["conv2_b"], 1)
    s2 = pallas_similarity(out.reshape(N, -1))
    out2d = out.reshape(M, C)
    st2 = pallas_bn_stats(out2d)

    if params["has_shortcut"]:
        # 1x1 projection shortcut as a tiled MXU matmul
        x_sub = x[:, ::stride, ::stride, :]
        sc = pallas_matmul_bias(x_sub.reshape(M, x.shape[-1]),
                                params["sc_w"], params["sc_b"])
        sskip = pallas_similarity(sc.reshape(N, -1))
        st_sc = pallas_bn_stats(sc)
        # relu(relu(bn2(conv2)) + bn_sc(shortcut))  -- single fused pass
        out = pallas_bn_tail(out2d, st2, params["bn2_gamma"], params["bn2_beta"],
                             residual=sc,
                             res_params=(st_sc, params["sc_gamma"], params["sc_beta"]))
        new_S = S + [s1, s2, sskip]
    else:
        # relu(relu(bn2(conv2)) + x)                -- single fused pass
        out = pallas_bn_tail(out2d, st2, params["bn2_gamma"], params["bn2_beta"],
                             residual=x.reshape(M, C))
        new_S = S + [s1, s2]

    # TODO(synk): BatchNorm running-stat (momentum) updates are not modeled;
    # they do not affect the train-mode forward output.
    out = out.reshape(N, Ho, Wo, C)
    return jnp.transpose(out, (0, 3, 1, 2)), new_S   # back to NCHW


if __name__ == "__main__":
    key = jax.random.PRNGKey(0)
    k_x, k_p = jax.random.split(key)

    in_planes, planes, stride = 4, 8, 2              # exercises the projection shortcut
    x = jax.random.normal(k_x, (2, in_planes, 16, 16), jnp.float32)
    params = init_basic_block_params(k_p, in_planes, planes, stride)

    out, S = basic_block_forward(params, (x, []))
    out = jax.block_until_ready(out)
    S = [jax.block_until_ready(s) for s in S]

    assert out.shape == (2, planes, 8, 8)
    assert len(S) == 3 and all(s.shape == (2, 2) for s in S)
    assert bool(jnp.all(jnp.isfinite(out)))
    assert all(bool(jnp.all(jnp.isfinite(s))) for s in S)
    print("KERNEL_OK")
</pallas_src>

<mosaic_0001>
module attributes {stable_mosaic.version = 11 : i64} {
  func.func @_conv3x3_kernel(%arg0: i32, %arg1: i32, %arg2: memref<1x4x9x9x4xbf16, #tpu.memory_space<vmem>>, %arg3: memref<3x3x4x8xbf16, #tpu.memory_space<vmem>>, %arg4: memref<1x8xf32, #tpu.memory_space<vmem>>, %arg5: memref<1x8x8x8xf32, #tpu.memory_space<vmem>>) attributes {dimension_semantics = [#tpu.dimension_semantics<parallel>, #tpu.dimension_semantics<parallel>], iteration_bounds = array<i64: 2, 1>, scalar_prefetch = 0 : i64, scratch_operands = 0 : i64, tpu.core_type = #tpu.core_type<tc>, window_params = [{transform_indices = @transform_0, window_bounds = array<i64: 1, 4, 9, 9, 4>}, {transform_indices = @transform_1, window_bounds = array<i64: 3, 3, 4, 8>}, {transform_indices = @transform_2, window_bounds = array<i64: 1, 8>}, {transform_indices = @transform_3, window_bounds = array<i64: 1, 8, 8, 8>}]} {
    %cst = arith.constant 0.000000e+00 : f32
    %0 = vector.broadcast %cst : f32 to vector<64x8xf32>
    %c0 = arith.constant 0 : index
    %c0_0 = arith.constant 0 : index
    %c0_1 = arith.constant 0 : index
    %c0_2 = arith.constant 0 : index
    %c0_3 = arith.constant 0 : index
    %1 = vector.load %arg2[%c0, %c0_0, %c0_1, %c0_2, %c0_3] : memref<1x4x9x9x4xbf16, #tpu.memory_space<vmem>>, vector<1x1x8x8x4xbf16>
    %2 = vector.shape_cast %1 : vector<1x1x8x8x4xbf16> to vector<8x8x4xbf16>
    %3 = vector.shape_cast %2 : vector<8x8x4xbf16> to vector<64x4xbf16>
    %c0_4 = arith.constant 0 : index
    %c0_5 = arith.constant 0 : index
    %c0_6 = arith.constant 0 : index
    %c0_7 = arith.constant 0 : index
    %4 = vector.load %arg3[%c0_4, %c0_5, %c0_6, %c0_7] : memref<3x3x4x8xbf16, #tpu.memory_space<vmem>>, vector<1x1x4x8xbf16>
    %5 = vector.shape_cast %4 : vector<1x1x4x8xbf16> to vector<4x8xbf16>
    %cst_8 = arith.constant dense<0.000000e+00> : vector<64x8xf32>
    %6 = tpu.matmul %3, %5, %cst_8 {dimension_numbers = #tpu.dot_dimension_numbers<[1], [0], [0], [1], [0, 0, 1, 1], [], []>} : vector<64x4xbf16>, vector<4x8xbf16>, vector<64x8xf32> -> vector<64x8xf32>
    %7 = arith.addf %0, %6 : vector<64x8xf32>
    %c0_9 = arith.constant 0 : index
    %c1 = arith.constant 1 : index
    %c0_10 = arith.constant 0 : index
    %c0_11 = arith.constant 0 : index
    %c0_12 = arith.constant 0 : index
    %8 = vector.load %arg2[%c0_9, %c1, %c0_10, %c0_11, %c0_12] : memref<1x4x9x9x4xbf16, #tpu.memory_space<vmem>>, vector<1x1x8x8x4xbf16>
    %9 = vector.shape_cast %8 : vector<1x1x8x8x4xbf16> to vector<8x8x4xbf16>
    %10 = vector.shape_cast %9 : vector<8x8x4xbf16> to vector<64x4xbf16>
    %c0_13 = arith.constant 0 : index
    %c1_14 = arith.constant 1 : index
    %c0_15 = arith.constant 0 : index
    %c0_16 = arith.constant 0 : index
    %11 = vector.load %arg3[%c0_13, %c1_14, %c0_15, %c0_16] : memref<3x3x4x8xbf16, #tpu.memory_space<vmem>>, vector<1x1x4x8xbf16>
    %12 = vector.shape_cast %11 : vector<1x1x4x8xbf16> to vector<4x8xbf16>
    %cst_17 = arith.constant dense<0.000000e+00> : vector<64x8xf32>
    %13 = tpu.matmul %10, %12, %cst_17 {dimension_numbers = #tpu.dot_dimension_numbers<[1], [0], [0], [1], [0, 0, 1, 1], [], []>} : vector<64x4xbf16>, vector<4x8xbf16>, vector<64x8xf32> -> vector<64x8xf32>
    %14 = arith.addf %7, %13 : vector<64x8xf32>
    %c0_18 = arith.constant 0 : index
    %c0_19 = arith.constant 0 : index
    %c0_20 = arith.constant 0 : index
    %c1_21 = arith.constant 1 : index
    %c0_22 = arith.constant 0 : index
    %15 = vector.load %arg2[%c0_18, %c0_19, %c0_20, %c1_21, %c0_22] : memref<1x4x9x9x4xbf16, #tpu.memory_space<vmem>>, vector<1x1x8x8x4xbf16>
    %16 = vector.shape_cast %15 : vector<1x1x8x8x4xbf16> to vector<8x8x4xbf16>
    %17 = vector.shape_cast %16 : vector<8x8x4xbf16> to vector<64x4xbf16>
    %c0_23 = arith.constant 0 : index
    %c2 = arith.constant 2 : index
    %c0_24 = arith.constant 0 : index
    %c0_25 = arith.constant 0 : index
    %18 = vector.load %arg3[%c0_23, %c2, %c0_24, %c0_25] : memref<3x3x4x8xbf16, #tpu.memory_space<vmem>>, vector<1x1x4x8xbf16>
    %19 = vector.shape_cast %18 : vector<1x1x4x8xbf16> to vector<4x8xbf16>
    %cst_26 = arith.constant dense<0.000000e+00> : vector<64x8xf32>
    %20 = tpu.matmul %17, %19, %cst_26 {dimension_numbers = #tpu.dot_dimension_numbers<[1], [0], [0], [1], [0, 0, 1, 1], [], []>} : vector<64x4xbf16>, vector<4x8xbf16>, vector<64x8xf32> -> vector<64x8xf32>
    %21 = arith.addf %14, %20 : vector<64x8xf32>
    %c0_27 = arith.constant 0 : index
    %c2_28 = arith.constant 2 : index
    %c0_29 = arith.constant 0 : index
    %c0_30 = arith.constant 0 : index
    %c0_31 = arith.constant 0 : index
    %22 = vector.load %arg2[%c0_27, %c2_28, %c0_29, %c0_30, %c0_31] : memref<1x4x9x9x4xbf16, #tpu.memory_space<vmem>>, vector<1x1x8x8x4xbf16>
    %23 = vector.shape_cast %22 : vector<1x1x8x8x4xbf16> to vector<8x8x4xbf16>
    %24 = vector.shape_cast %23 : vector<8x8x4xbf16> to vector<64x4xbf16>
    %c1_32 = arith.constant 1 : index
    %c0_33 = arith.constant 0 : index
    %c0_34 = arith.constant 0 : index
    %c0_35 = arith.constant 0 : index
    %25 = vector.load %arg3[%c1_32, %c0_33, %c0_34, %c0_35] : memref<3x3x4x8xbf16, #tpu.memory_space<vmem>>, vector<1x1x4x8xbf16>
    %26 = vector.shape_cast %25 : vector<1x1x4x8xbf16> to vector<4x8xbf16>
    %cst_36 = arith.constant dense<0.000000e+00> : vector<64x8xf32>
    %27 = tpu.matmul %24, %26, %cst_36 {dimension_numbers = #tpu.dot_dimension_numbers<[1], [0], [0], [1], [0, 0, 1, 1], [], []>} : vector<64x4xbf16>, vector<4x8xbf16>, vector<64x8xf32> -> vector<64x8xf32>
    %28 = arith.addf %21, %27 : vector<64x8xf32>
    %c0_37 = arith.constant 0 : index
    %c3 = arith.constant 3 : index
    %c0_38 = arith.constant 0 : index
    %c0_39 = arith.constant 0 : index
    %c0_40 = arith.constant 0 : index
    %29 = vector.load %arg2[%c0_37, %c3, %c0_38, %c0_39, %c0_40] : memref<1x4x9x9x4xbf16, #tpu.memory_space<vmem>>, vector<1x1x8x8x4xbf16>
    %30 = vector.shape_cast %29 : vector<1x1x8x8x4xbf16> to vector<8x8x4xbf16>
    %31 = vector.shape_cast %30 : vector<8x8x4xbf16> to vector<64x4xbf16>
    %c1_41 = arith.constant 1 : index
    %c1_42 = arith.constant 1 : index
    %c0_43 = arith.constant 0 : index
    %c0_44 = arith.constant 0 : index
    %32 = vector.load %arg3[%c1_41, %c1_42, %c0_43, %c0_44] : memref<3x3x4x8xbf16, #tpu.memory_space<vmem>>, vector<1x1x4x8xbf16>
    %33 = vector.shape_cast %32 : vector<1x1x4x8xbf16> to vector<4x8xbf16>
    %cst_45 = arith.constant dense<0.000000e+00> : vector<64x8xf32>
    %34 = tpu.matmul %31, %33, %cst_45 {dimension_numbers = #tpu.dot_dimension_numbers<[1], [0], [0], [1], [0, 0, 1, 1], [], []>} : vector<64x4xbf16>, vector<4x8xbf16>, vector<64x8xf32> -> vector<64x8xf32>
    %35 = arith.addf %28, %34 : vector<64x8xf32>
    %c0_46 = arith.constant 0 : index
    %c2_47 = arith.constant 2 : index
    %c0_48 = arith.constant 0 : index
    %c1_49 = arith.constant 1 : index
    %c0_50 = arith.constant 0 : index
    %36 = vector.load %arg2[%c0_46, %c2_47, %c0_48, %c1_49, %c0_50] : memref<1x4x9x9x4xbf16, #tpu.memory_space<vmem>>, vector<1x1x8x8x4xbf16>
    %37 = vector.shape_cast %36 : vector<1x1x8x8x4xbf16> to vector<8x8x4xbf16>
    %38 = vector.shape_cast %37 : vector<8x8x4xbf16> to vector<64x4xbf16>
    %c1_51 = arith.constant 1 : index
    %c2_52 = arith.constant 2 : index
    %c0_53 = arith.constant 0 : index
    %c0_54 = arith.constant 0 : index
    %39 = vector.load %arg3[%c1_51, %c2_52, %c0_53, %c0_54] : memref<3x3x4x8xbf16, #tpu.memory_space<vmem>>, vector<1x1x4x8xbf16>
    %40 = vector.shape_cast %39 : vector<1x1x4x8xbf16> to vector<4x8xbf16>
    %cst_55 = arith.constant dense<0.000000e+00> : vector<64x8xf32>
    %41 = tpu.matmul %38, %40, %cst_55 {dimension_numbers = #tpu.dot_dimension_numbers<[1], [0], [0], [1], [0, 0, 1, 1], [], []>} : vector<64x4xbf16>, vector<4x8xbf16>, vector<64x8xf32> -> vector<64x8xf32>
    %42 = arith.addf %35, %41 : vector<64x8xf32>
    %c0_56 = arith.constant 0 : index
    %c0_57 = arith.constant 0 : index
    %c1_58 = arith.constant 1 : index
    %c0_59 = arith.constant 0 : index
    %c0_60 = arith.constant 0 : index
    %43 = vector.load %arg2[%c0_56, %c0_57, %c1_58, %c0_59, %c0_60] : memref<1x4x9x9x4xbf16, #tpu.memory_space<vmem>>, vector<1x1x8x8x4xbf16>
    %44 = vector.shape_cast %43 : vector<1x1x8x8x4xbf16> to vector<8x8x4xbf16>
    %45 = vector.shape_cast %44 : vector<8x8x4xbf16> to vector<64x4xbf16>
    %c2_61 = arith.constant 2 : index
    %c0_62 = arith.constant 0 : index
    %c0_63 = arith.constant 0 : index
    %c0_64 = arith.constant 0 : index
    %46 = vector.load %arg3[%c2_61, %c0_62, %c0_63, %c0_64] : memref<3x3x4x8xbf16, #tpu.memory_space<vmem>>, vector<1x1x4x8xbf16>
    %47 = vector.shape_cast %46 : vector<1x1x4x8xbf16> to vector<4x8xbf16>
    %cst_65 = arith.constant dense<0.000000e+00> : vector<64x8xf32>
    %48 = tpu.matmul %45, %47, %cst_65 {dimension_numbers = #tpu.dot_dimension_numbers<[1], [0], [0], [1], [0, 0, 1, 1], [], []>} : vector<64x4xbf16>, vector<4x8xbf16>, vector<64x8xf32> -> vector<64x8xf32>
    %49 = arith.addf %42, %48 : vector<64x8xf32>
    %c0_66 = arith.constant 0 : index
    %c1_67 = arith.constant 1 : index
    %c1_68 = arith.constant 1 : index
    %c0_69 = arith.constant 0 : index
    %c0_70 = arith.constant 0 : index
    %50 = vector.load %arg2[%c0_66, %c1_67, %c1_68, %c0_69, %c0_70] : memref<1x4x9x9x4xbf16, #tpu.memory_space<vmem>>, vector<1x1x8x8x4xbf16>
    %51 = vector.shape_cast %50 : vector<1x1x8x8x4xbf16> to vector<8x8x4xbf16>
    %52 = vector.shape_cast %51 : vector<8x8x4xbf16> to vector<64x4xbf16>
    %c2_71 = arith.constant 2 : index
    %c1_72 = arith.constant 1 : index
    %c0_73 = arith.constant 0 : index
    %c0_74 = arith.constant 0 : index
    %53 = vector.load %arg3[%c2_71, %c1_72, %c0_73, %c0_74] : memref<3x3x4x8xbf16, #tpu.memory_space<vmem>>, vector<1x1x4x8xbf16>
    %54 = vector.shape_cast %53 : vector<1x1x4x8xbf16> to vector<4x8xbf16>
    %cst_75 = arith.constant dense<0.000000e+00> : vector<64x8xf32>
    %55 = tpu.matmul %52, %54, %cst_75 {dimension_numbers = #tpu.dot_dimension_numbers<[1], [0], [0], [1], [0, 0, 1, 1], [], []>} : vector<64x4xbf16>, vector<4x8xbf16>, vector<64x8xf32> -> vector<64x8xf32>
    %56 = arith.addf %49, %55 : vector<64x8xf32>
    %c0_76 = arith.constant 0 : index
    %c0_77 = arith.constant 0 : index
    %c1_78 = arith.constant 1 : index
    %c1_79 = arith.constant 1 : index
    %c0_80 = arith.constant 0 : index
    %57 = vector.load %arg2[%c0_76, %c0_77, %c1_78, %c1_79, %c0_80] : memref<1x4x9x9x4xbf16, #tpu.memory_space<vmem>>, vector<1x1x8x8x4xbf16>
    %58 = vector.shape_cast %57 : vector<1x1x8x8x4xbf16> to vector<8x8x4xbf16>
    %59 = vector.shape_cast %58 : vector<8x8x4xbf16> to vector<64x4xbf16>
    %c2_81 = arith.constant 2 : index
    %c2_82 = arith.constant 2 : index
    %c0_83 = arith.constant 0 : index
    %c0_84 = arith.constant 0 : index
    %60 = vector.load %arg3[%c2_81, %c2_82, %c0_83, %c0_84] : memref<3x3x4x8xbf16, #tpu.memory_space<vmem>>, vector<1x1x4x8xbf16>
    %61 = vector.shape_cast %60 : vector<1x1x4x8xbf16> to vector<4x8xbf16>
    %cst_85 = arith.constant dense<0.000000e+00> : vector<64x8xf32>
    %62 = tpu.matmul %59, %61, %cst_85 {dimension_numbers = #tpu.dot_dimension_numbers<[1], [0], [0], [1], [0, 0, 1, 1], [], []>} : vector<64x4xbf16>, vector<4x8xbf16>, vector<64x8xf32> -> vector<64x8xf32>
    %63 = arith.addf %56, %62 : vector<64x8xf32>
    %c0_86 = arith.constant 0 : index
    %c0_87 = arith.constant 0 : index
    %64 = vector.load %arg4[%c0_86, %c0_87] : memref<1x8xf32, #tpu.memory_space<vmem>>, vector<1x8xf32>
    %65 = vector.broadcast %64 : vector<1x8xf32> to vector<64x8xf32>
    %66 = arith.addf %63, %65 : vector<64x8xf32>
    %67 = vector.shape_cast %66 : vector<64x8xf32> to vector<1x8x8x8xf32>
    %c0_88 = arith.constant 0 : index
    %c0_89 = arith.constant 0 : index
    %c0_90 = arith.constant 0 : index
    %c0_91 = arith.constant 0 : index
    %68 = vector.load %arg5[%c0_88, %c0_89, %c0_90, %c0_91] : memref<1x8x8x8xf32, #tpu.memory_space<vmem>>, vector<1x8x8x8xf32>
    tpu.vector_store %arg5[%c0_88, %c0_89, %c0_90, %c0_91], %67 {strides = array<i32>} : memref<1x8x8x8xf32, #tpu.memory_space<vmem>>, vector<1x8x8x8xf32>,
    return
  }
  func.func @transform_0(%arg0: i32, %arg1: i32) -> (i32, i32, i32, i32, i32) {
    %c0_i32 = arith.constant 0 : i32
    %c0_i32_0 = arith.constant 0 : i32
    %c0_i32_1 = arith.constant 0 : i32
    %c0_i32_2 = arith.constant 0 : i32
    %c0_i32_3 = arith.constant 0 : i32
    return %arg0, %c0_i32, %c0_i32_0, %c0_i32_1, %c0_i32_2 : i32, i32, i32, i32, i32
  }
  func.func @transform_1(%arg0: i32, %arg1: i32) -> (i32, i32, i32, i32) {
    %c0_i32 = arith.constant 0 : i32
    %c0_i32_0 = arith.constant 0 : i32
    %c0_i32_1 = arith.constant 0 : i32
    %c0_i32_2 = arith.constant 0 : i32
    return %c0_i32, %c0_i32_0, %c0_i32_1, %arg1 : i32, i32, i32, i32
  }
  func.func @transform_2(%arg0: i32, %arg1: i32) -> (i32, i32) {
    %c0_i32 = arith.constant 0 : i32
    %c0_i32_0 = arith.constant 0 : i32
    return %c0_i32, %arg1 : i32, i32
  }
  func.func @transform_3(%arg0: i32, %arg1: i32) -> (i32, i32, i32, i32) {
    %c0_i32 = arith.constant 0 : i32
    %c0_i32_0 = arith.constant 0 : i32
    %c0_i32_1 = arith.constant 0 : i32
    return %arg0, %c0_i32, %c0_i32_0, %arg1 : i32, i32, i32, i32
  }
}

</mosaic_0001>

<bundles_post_ra>
// kernel: tpu_custom_call.1
= control target key start
LH: loop header
LB: loop body
LE: loop exit
PB: predicated region body
PF: predicated region fallthrough
CT: control target
= control target key end

     0   :  { %8 = vsyncpa [#allocation3], 0  ;;  %s2618_s0 = inlined_call_operand.vmem [shape: bf16[2,4,9,9,4], index: 0, kind: input, shape index: {}]   ;;  %s2619_s1 = inlined_call_operand.vmem [shape: bf16[3,3,4,8], index: 1, kind: input, shape index: {}]   ;;  %s2620_s2 = inlined_call_operand.vmem [shape: f32[1,8], index: 2, kind: input, shape index: {}]   ;;  %s2621_s3 = inlined_call_operand.hbm [shape: f32[2,8,8,8], index: 3, kind: output, shape index: {}]  }
   0x1   :  { %10 = vsyncpa [#allocation3 + $0x1], 0  ;;  %s2242_s12 = smov 0   ;;  %s2244_s13 = smov 0  }
   0x2   :  { %s2246_s14 = smov 0   ;;  %s2248_s15 = smov 0  }
   0x3   :  { %s2250_s16 = smov 0   ;;  %s2252_s17 = smov 0  }
   0x4 LB: > { %s1744_s18 = sadd.s32 4294967295, %s2217_s17   ;;  %s1745_s19 = sadd.s32 4294967294, %s2217_s17   ;;  %s2217_s17 = sphi %s2252_s17, %s16_s17   ;;  %s2213_s16 = sphi %s2250_s16, %s2630_s16   ;;  %s2209_s15 = sphi %s2248_s15, %s2629_s15   ;;  %s2205_s14 = sphi %s2246_s14, %s2628_s14   ;;  %s2201_s13 = sphi %s2244_s13, %s2627_s13   ;;  %s2197_s12 = sphi %s2242_s12, %s2626_s12  }
   0x5   : > { %s28_s20 = sadd.s32 1, %s2213_s16  ;;  %s115_s21 = sadd.s32 1, %s2205_s14 }
   0x6   : > { %p30_p0 = scmp.ge.s32.totalorder %s28_s20, 2  ;;  %p125_p1 = scmp.ne.s32.totalorder %s2205_s14, %s2201_s13 }
   0x7   : > { %p126_p2 = scmp.eq.s32.totalorder %s1744_s18, 1  ;;  %p131_p3 = scmp.ne.s32.totalorder %s2201_s13, %s2197_s12 }
   0x8   : > { %s2632_s20 = smov (%p30_p0, %s28_s20), 0  ;;  %p132_p5 = scmp.eq.s32.totalorder %s1745_s19, 1 }
   0x9   : > { %p2282_p4 = por %p126_p2, %p125_p1  ;;  %s110_s23 = ssub.s32 %s2213_s16, %s2632_s20 }
   0xa   : > { %p1750_p6 = scmp.ge.s32.totalorder %s2217_s17, 1  ;;  %p113_p7 = scmp.eq.s32.totalorder %s110_s23, 0 }
   0xb   : > { %p2289_p8 = por %p132_p5, %p131_p3  ;;  %p171_p9 = scmp.lt.s32.totalorder %s2217_s17, 3 }
   0xc   : > { %s2295_s25 = scalar_select %p113_p7, %s2205_s14, %s115_s21  }
   0xd   : > { %p172_p10 = pnand %p1750_p6, %p171_p9 }
   0xe   : > { %p202_p11 = scmp.lt.s32.totalorder (!%p172_p10), %s2209_s15, 1  ;;  %s1911_s10 = sshll.u32 (!%p172_p10), %s2209_s15, 10 }
   0xf   : > { %175 = sbr.rel (%p172_p10) target bundleno = 319 (0x13f), region = 32  ;;  %s2563_s21 = scalar_lea.hbm (!%p172_p10), %s2621_s3, %s1911_s10 }
  0x10   : > { %s2219_s26 = smov (!%p172_p10), [#allocation2]  }
  0x11   : > { %s2145_s27 = sshll.u32 (!%p172_p10), %s2219_s26, 4  ;;  %s2146_s27 = int_to_ptr.vmem [resolvable:$false] %s2145_s27 }
  0x12   : > { %s2147_s28 = scalar_lea.vmem (!%p172_p10), %s2146_s27, 2048 }
  0x14   : > { %v1761_v0 = vld [vmem:[%s2619_s1 + $0x2] sm:$0x3]  ;;  %vm268_vm0 = vcmask 1041408   ;;  %v223_v2 = vld [vmem:[%s2619_s1] sm:$0x3]  ;;  %s203_s5 = scalar_select %p202_p11, %s2209_s15, 1 }
  0x15   : > { %2050 = vmatprep.subr.msk.bf16.mxu1 %vm268_vm0, %v1761_v0  ;;  %2049 = vmatprep.subr.msk.bf16.mxu0 %vm268_vm0, %v1761_v0  ;;  %v270_v1 = vsel %vm268_vm0, %v1761_v0, 0  ;;  %v1778_v3 = vld [vmem:[%s2619_s1 + $0x4] sm:$0x3]  ;;  %vm255_vm1 = vcmask 31744   ;;  %v370_v4 = vsel %vm268_vm0, %v223_v2, 0  ;;  %vm1621_vm5 = vcmask 64512  }
  0x16   : > { %2048 = vmatpush3.bf16.msra.mxu1 %v270_v1  ;;  %1958 = vmatpush3.bf16.msra.mxu0 %v270_v1  ;;  %s2059_s6 = smul.u32 288, %s203_s5  ;;  %v595_v5 = vsel %vm268_vm0, %v1778_v3, 0  ;;  %v1795_v7 = vld [vmem:[%s2619_s1 + $0x6] sm:$0x3]  ;;  %v1812_v8 = vld [vmem:[%s2619_s1 + $0x8] sm:$0x3] }
  0x17   : > { %2051 = vmatprep.subr.msk.bf16.mxu1 %vm268_vm0, %v223_v2  ;;  %2052 = vmatprep.subr.msk.bf16.mxu0 %vm268_vm0, %v1778_v3  ;;  %vm453_vm2 = vsmask.f32 3328  ;;  %vm454_vm3 = vsmask.f32 7440  ;;  %v714_v13 = vsel %vm268_vm0, %v1795_v7, 0  ;;  %v2337_v14 = vsel %vm268_vm0, %v1812_v8, 0 }
  0x18   : > { %s2316_s9 = scalar_lea.vmem %s2618_s0, %s2059_s6  ;;  %v2354_v38 = vld [vmem:[%s2619_s1 + $0xa] sm:$0x3]  ;;  %vm2358_vm4 = vmor %vm453_vm2, %vm454_vm3  ;;  %s199_s5 = sand.u32 1, %s2201_s13  }
  0x19   : > { %v2117_v6 = vld [vmem:[%s2316_s9 + $0x48] ss:$8 sps:$4 sm:$0xff]   ;;  %v2119_v10 = vld [vmem:[%s2316_s9 + $0x58] ss:$8 sps:$4 sm:$0xff]   ;;  %v438_v16 = vld [vmem:[%s2316_s9 + $0x4] sm:$0x1] }
  0x1a   : > { %v2118_v9 = vld [vmem:[%s2316_s9 + $0x68] ss:$8 sps:$4 sm:$0xff]   ;;  %1959 = vmatprep.mubr.msk.bf16.mxu0 %vm255_vm1, %v2117_v6  ;;  %v2120_v11 = vld [vmem:[%s2316_s9 + $0x78] ss:$8 sps:$4 sm:$0xff]   ;;  %v440_v19 = vld [vmem:[%s2316_s9 + $0xc] sm:$0x1] }
  0x1b   : > { %1963 = vmatprep.mubr.msk.bf16.mxu1 %vm255_vm1, %v2118_v9  ;;  %1960 = vmatmul.mubr.msk.bf16.vlgmr.msra.gmra.mxu0 %vm255_vm1, %v2119_v10  ;;  %v2121_v12 = vld [vmem:[%s2316_s9] ss:$8 sps:$4 sm:$0xff]   ;;  %v2122_v18 = vld [vmem:[%s2316_s9 + $0x10] ss:$8 sps:$4 sm:$0xff]   ;;  %v466_v22 = vshll.u32 %v438_v16, 16  ;;  %v480_v25 = vshll.u32 %v440_v19, 16 }
  0x1c   : > { %1964 = vmatmul.mubr.msk.bf16.vlgmr.msra.gmra.mxu1 %vm255_vm1, %v2120_v11  ;;  %1978 = vmatpush3.bf16.msra.mxu0 %v595_v5  ;;  %v437_v15 = vld [vmem:[%s2316_s9] sm:$0xf]  ;;  %v439_v17 = vld [vmem:[%s2316_s9 + $0x8] sm:$0xf]  ;;  %v441_v26 = vld [vmem:[%s2316_s9 + $0x10] sm:$0xf] }
  0x1d   : > { %1968 = vmatpush3.bf16.msra.mxu1 %v370_v4  ;;  %1969 = vmatprep.mubr.msk.bf16.mxu1 %vm255_vm1, %v2121_v12  ;;  %v457_v20 = vshrl.u32 %v437_v15, 16  ;;  %v460_v21 = vshll.u32 %v437_v15, 16  ;;  %v471_v23 = vshrl.u32 %v439_v17, 16  ;;  %v474_v24 = vshll.u32 %v439_v17, 16  ;;  %v442_v27 = vld [vmem:[%s2316_s9 + $0x14] sm:$0x1] }
  0x1e   : > { %2053 = vmatprep.subr.msk.bf16.mxu1 %vm268_vm0, %v1795_v7  ;;  %2054 = vmatprep.subr.msk.bf16.mxu0 %vm268_vm0, %v1812_v8  ;;  %v468_v30 = vrot.slane %v466_v22, 5  ;;  %v443_v32 = vld [vmem:[%s2316_s9 + $0x18] sm:$0xf]  ;;  %v482_v34 = vrot.slane %v480_v25, 5  ;;  %v444_v35 = vld [vmem:[%s2316_s9 + $0x1c] sm:$0x1] }
  0x1f   : > { %v459_v28 = vrot.slane %v457_v20, 4  ;;  %v462_v29 = vrot.slane %v460_v21, 5  ;;  %v473_v31 = vrot.slane %v471_v23, 4  ;;  %v476_v33 = vrot.slane %v474_v24, 5  ;;  %v2123_v52 = vld [vmem:[%s2316_s9 + $0x20] ss:$8 sps:$4 sm:$0xff]  }
  0x20   : > { %v485_v36 = vshrl.u32 %v441_v26, 16  ;;  %v488_v37 = vshll.u32 %v441_v26, 16  ;;  %v494_v40 = vshll.u32 %v442_v27, 16  ;;  %v499_v41 = vshrl.u32 %v443_v32, 16  ;;  %v2124_v58 = vld [vmem:[%s2316_s9 + $0x30] ss:$8 sps:$4 sm:$0xff]  }
  0x21   : > { %v463_v39 = vor.u32 %v462_v29, %v459_v28  ;;  %v502_v42 = vshll.u32 %v443_v32, 16  ;;  %v477_v44 = vor.u32 %v476_v33, %v473_v31  ;;  %v508_v47 = vshll.u32 %v444_v35, 16  ;;  %v445_v59 = vld [vmem:[%s2316_s9 + $0x20] sm:$0xf]  ;;  %v446_v60 = vld [vmem:[%s2316_s9 + $0x24] sm:$0x1] }
  0x22   : > { %v487_v45 = vrot.slane %v485_v36, 4  ;;  %v490_v46 = vrot.slane %v488_v37, 5  ;;  %v496_v49 = vrot.slane %v494_v40, 5  ;;  %v501_v50 = vrot.slane %v499_v41, 4  ;;  %v447_v63 = vld [vmem:[%s2316_s9 + $0x28] sm:$0xf] }
  0x23   : > { %v464_v48 = vrot.slane %v463_v39, 4  ;;  %v504_v51 = vrot.slane %v502_v42, 5  ;;  %v478_v53 = vrot.slane %v477_v44, 4  ;;  %v510_v55 = vrot.slane %v508_v47, 5  ;;  %v448_v0 = vld [vmem:[%s2316_s9 + $0x2c] sm:$0x1] }
  0x24   : > { %1970 = vmatmul.mubr.msk.bf16.vlgmr.msra.gmra.mxu1 %vm255_vm1, %v2122_v18  ;;  %v491_v54 = vor.u32 %v490_v46, %v487_v45  ;;  %v513_v1 = vshrl.u32 %v445_v59, 16  ;;  %v516_v4 = vshll.u32 %v445_v59, 16  ;;  %v522_v5 = vshll.u32 %v446_v60, 16  ;;  %v449_v6 = vld [vmem:[%s2316_s9 + $0x30] sm:$0xf]  ;;  %s1751_s6 = sshll.u32 %s199_s5, 6 }
  0x25   : > { %1988 = vmatpush3.bf16.msra.mxu1 %v714_v13  ;;  %v469_v56 = vsel %vm2358_vm4, %v464_v48, %v468_v30  ;;  %v505_v57 = vor.u32 %v504_v51, %v501_v50  ;;  %1973 = vmatprep.mubr.msk.bf16.mxu1 %vm255_vm1, %v2123_v52  ;;  %v483_v61 = vsel %vm2358_vm4, %v478_v53, %v482_v34  ;;  %v527_v9 = vshrl.u32 %v447_v63, 16  ;;  %v450_v11 = vld [vmem:[%s2316_s9 + $0x34] sm:$0x1]  ;;  %v451_v17 = vld [vmem:[%s2316_s9 + $0x38] sm:$0xf]  ;;  %s2573_s15 = scalar_lea.sflag [#allocation3], %s199_s5 }
  0x26   : > { %2055 = vmatprep.subr.msk.bf16.mxu1 %vm268_vm0, %v2354_v38  ;;  %v492_v62 = vrot.slane %v491_v54, 4  ;;  %v1779_v2 = vcombine.low %v469_v56, %v483_v61  ;;  %v515_v8 = vrot.slane %v513_v1, 4  ;;  %v530_v10 = vshll.u32 %v447_v63, 16  ;;  %v1854_v18 = vld [vmem:[%s2619_s1 + $0xc] sm:$0x3] }
  0x27   : > { %v506_v3 = vrot.slane %v505_v57, 4  ;;  %v518_v13 = vrot.slane %v516_v4, 5  ;;  %v524_v15 = vrot.slane %v522_v5, 5  ;;  %v536_v16 = vshll.u32 %v448_v0, 16  ;;  %v452_v22 = vld [vmem:[%s2316_s9 + $0x3c] sm:$0x1] }
  0x28   : > { %v497_v7 = vsel %vm2358_vm4, %v492_v62, %v496_v49  ;;  %1979 = vmatprep.mubr.msk.bf16.mxu0 %vm255_vm1, %v1779_v2  ;;  %v529_v20 = vrot.slane %v527_v9, 4  ;;  %v532_v21 = vrot.slane %v530_v10, 5  ;;  %v541_v23 = vshrl.u32 %v449_v6, 16  ;;  %v2125_v35 = vld [vmem:[%s2316_s9 + $0x90] ss:$8 sps:$4 sm:$0xff]  }
  0x29   : > { %v511_v12 = vsel %vm2358_vm4, %v506_v3, %v510_v55  ;;  %v519_v24 = vor.u32 %v518_v13, %v515_v8  ;;  %v538_v25 = vrot.slane %v536_v16, 5  ;;  %v544_v26 = vshll.u32 %v449_v6, 16  ;;  %v2126_v44 = vld [vmem:[%s2316_s9 + $0xa0] ss:$8 sps:$4 sm:$0xff]   ;;  %v1871_v51 = vld [vmem:[%s2619_s1 + $0xe] sm:$0x3] }
  0x2a   : > { %v1780_v19 = vcombine.low %v497_v7, %v511_v12  ;;  %v550_v27 = vshll.u32 %v450_v11, 16  ;;  %v533_v28 = vor.u32 %v532_v21, %v529_v20  ;;  %v543_v29 = vrot.slane %v541_v23, 4  ;;  %v2129_v53 = vld [vmem:[%s2316_s9 + $0xb0] ss:$8 sps:$4 sm:$0xff]   ;;  %v2130_v57 = vld [vmem:[%s2316_s9 + $0xc0] ss:$8 sps:$4 sm:$0xff]  }
  0x2b   : > { %v555_v30 = vshrl.u32 %v451_v17, 16  ;;  %v558_v31 = vshll.u32 %v451_v17, 16  ;;  %v520_v32 = vrot.slane %v519_v24, 4  ;;  %v546_v33 = vrot.slane %v544_v26, 5  ;;  %v1822_v59 = vld [vmem:[%s2316_s9 + $0x94] sm:$0x1] }
  0x2c   : > { %1974 = vmatmul.mubr.msk.bf16.gmra.mxu1 %vm255_vm1, %v2124_v58  ;;  %1980 = vmatmul.mubr.msk.bf16.vlgmr.msra.gmra.mxu0 %vm255_vm1, %v1780_v19  ;;  %v564_v34 = vshll.u32 %v452_v22, 16  ;;  %v534_v36 = vrot.slane %v533_v28, 4  ;;  %v552_v42 = vrot.slane %v550_v27, 5  ;;  %v1063_v49 = vsel %vm268_vm0, %v2354_v38, 0  ;;  %v2127_v38 = vld [vmem:[%s2316_s9 + $0xd8] ss:$8 sps:$4 sm:$0xff]  }
  0x2d   : > { %1998 = vmatpush3.bf16.msra.mxu0 %v2337_v14  ;;  %v557_v37 = vrot.slane %v555_v30, 4  ;;  %v560_v39 = vrot.slane %v558_v31, 5  ;;  %v525_v40 = vsel %vm2358_vm4, %v520_v32, %v524_v15  ;;  %v547_v41 = vor.u32 %v546_v33, %v543_v29  ;;  %1989 = vmatprep.mubr.msk.bf16.mxu1 %vm255_vm1, %v2125_v35  ;;  %v1821_v58 = vld [vmem:[%s2316_s9 + $0x90] sm:$0xf]  ;;  %v1823_v60 = vld [vmem:[%s2316_s9 + $0x98] sm:$0xf] }
  0x2e   : > { %2056 = vmatprep.subr.msk.bf16.mxu0 %vm268_vm0, %v1854_v18  ;;  %v539_v14 = vsel %vm2358_vm4, %v534_v36, %v538_v25  ;;  %v566_v46 = vrot.slane %v564_v34, 5  ;;  %v1182_v56 = vsel %vm268_vm0, %v1854_v18, 0  ;;  %v1824_v61 = vld [vmem:[%s2316_s9 + $0x9c] sm:$0x1]  ;;  %v925_v62 = vshrl.u32 %v1821_v58, 16 }
  0x2f   : > { %v561_v45 = vor.u32 %v560_v39, %v557_v37  ;;  %v1781_v47 = vcombine.low %v525_v40, %v539_v14  ;;  %v548_v48 = vrot.slane %v547_v41, 4  ;;  %v928_v63 = vshll.u32 %v1821_v58, 16  ;;  %v1825_v2 = vld [vmem:[%s2316_s9 + $0xa0] sm:$0xf]  ;;  %v2128_v3 = vld [vmem:[%s2316_s9 + $0xe8] ss:$8 sps:$4 sm:$0xff]  }
  0x30   : > { %v934_v0 = vshll.u32 %v1822_v59, 16  ;;  %v939_v1 = vshrl.u32 %v1823_v60, 16  ;;  %v942_v4 = vshll.u32 %v1823_v60, 16  ;;  %v948_v5 = vshll.u32 %v1824_v61, 16  ;;  %v1826_v6 = vld [vmem:[%s2316_s9 + $0xa4] sm:$0x1] }
  0x31   : > { %v562_v50 = vrot.slane %v561_v45, 4  ;;  %1983 = vmatprep.mubr.msk.bf16.mxu0 %vm255_vm1, %v1781_v47  ;;  %v553_v52 = vsel %vm2358_vm4, %v548_v48, %v552_v42  ;;  %v1827_v7 = vld [vmem:[%s2316_s9 + $0xa8] sm:$0xf]  ;;  %v2131_v8 = vld [vmem:[%s2316_s9 + $0xf8] ss:$8 sps:$4 sm:$0xff]   ;;  %v927_v9 = vrot.slane %v925_v62, 4 }
  0x32   : > { %v930_v10 = vrot.slane %v928_v63, 5  ;;  %v936_v11 = vrot.slane %v934_v0, 5  ;;  %v941_v12 = vrot.slane %v939_v1, 4  ;;  %v1828_v13 = vld [vmem:[%s2316_s9 + $0xac] sm:$0x1]  ;;  %v944_v15 = vrot.slane %v942_v4, 5 }
  0x33   : > { %v567_v54 = vsel %vm2358_vm4, %v562_v50, %v566_v46  ;;  %v950_v16 = vrot.slane %v948_v5, 5  ;;  %v953_v17 = vshrl.u32 %v1825_v2, 16  ;;  %v956_v18 = vshll.u32 %v1825_v2, 16  ;;  %v2432_v27 = vld [vmem:[%s2619_s1 + $0x10] sm:$0x3] }
  0x34   : > { %1990 = vmatmul.mubr.msk.bf16.vlgmr.msra.gmra.mxu1 %vm255_vm1, %v2126_v44  ;;  %v1782_v55 = vcombine.low %v553_v52, %v567_v54  ;;  %v931_v19 = vor.u32 %v930_v10, %v927_v9  ;;  %v962_v20 = vshll.u32 %v1826_v6, 16  ;;  %v967_v21 = vshrl.u32 %v1827_v7, 16  ;;  %v1829_v39 = vld [vmem:[%s2316_s9 + $0xb0] sm:$0xf]  ;;  %v1830_v40 = vld [vmem:[%s2316_s9 + $0xb4] sm:$0x1] }
  0x35   : > { %2008 = vmatpush3.bf16.msra.mxu1 %v1063_v49  ;;  %1993 = vmatprep.mubr.msk.bf16.mxu1 %vm255_vm1, %v2129_v53  ;;  %v970_v22 = vshll.u32 %v1827_v7, 16  ;;  %v945_v23 = vor.u32 %v944_v15, %v941_v12  ;;  %v955_v24 = vrot.slane %v953_v17, 4  ;;  %v958_v25 = vrot.slane %v956_v18, 5  ;;  %v1831_v41 = vld [vmem:[%s2316_s9 + $0xb8] sm:$0xf] }
  0x36   : > { %2057 = vmatprep.subr.msk.bf16.mxu1 %vm268_vm0, %v1871_v51  ;;  %1984 = vmatmul.mubr.msk.bf16.gmra.mxu0 %vm255_vm1, %v1782_v55  ;;  %v976_v26 = vshll.u32 %v1828_v13, 16  ;;  %v932_v28 = vrot.slane %v931_v19, 4  ;;  %v969_v29 = vrot.slane %v967_v21, 4  ;;  %v1301_v31 = vsel %vm268_vm0, %v1871_v51, 0  ;;  %v2132_v42 = vld [vmem:[%s2316_s9 + $0x108] ss:$8 sps:$4 sm:$0xff]  }
  0x37   : > { %1999 = vmatprep.mubr.msk.bf16.mxu0 %vm255_vm1, %v2127_v38  ;;  %v972_v30 = vrot.slane %v970_v22, 5  ;;  %v946_v32 = vrot.slane %v945_v23, 4  ;;  %v959_v33 = vor.u32 %v958_v25, %v955_v24  ;;  %v964_v34 = vrot.slane %v962_v20, 5  ;;  %v1832_v45 = vld [vmem:[%s2316_s9 + $0xbc] sm:$0x1] }
  0x38   : > { %v978_v35 = vrot.slane %v976_v26, 5  ;;  %v937_v36 = vsel %vm2358_vm4, %v932_v28, %v936_v11  ;;  %v981_v46 = vshrl.u32 %v1829_v39, 16  ;;  %v984_v47 = vshll.u32 %v1829_v39, 16  ;;  %v2133_v50 = vld [vmem:[%s2316_s9 + $0x8] ss:$8 sps:$4 sm:$0xff]  }
  0x39   : > { %v973_v37 = vor.u32 %v972_v30, %v969_v29  ;;  %v951_v44 = vsel %vm2358_vm4, %v946_v32, %v950_v16  ;;  %v960_v14 = vrot.slane %v959_v33, 4  ;;  %v990_v51 = vshll.u32 %v1830_v40, 16  ;;  %v1833_v53 = vld [vmem:[%s2316_s9 + $0xc0] sm:$0xf]  ;;  %v1835_v62 = vld [vmem:[%s2316_s9 + $0xc8] sm:$0xf] }
  0x3a   : > { %v1838_v48 = vcombine.low %v937_v36, %v951_v44  ;;  %v995_v52 = vshrl.u32 %v1831_v41, 16  ;;  %v983_v38 = vrot.slane %v981_v46, 4  ;;  %v986_v55 = vrot.slane %v984_v47, 5  ;;  %v1836_v2 = vld [vmem:[%s2316_s9 + $0xcc] sm:$0x1] }
  0x3b   : > { %v974_v49 = vrot.slane %v973_v37, 4  ;;  %v965_v54 = vsel %vm2358_vm4, %v960_v14, %v964_v34  ;;  %v992_v59 = vrot.slane %v990_v51, 5  ;;  %v1004_v61 = vshll.u32 %v1832_v45, 16  ;;  %v2134_v16 = vld [vmem:[%s2316_s9 + $0x18] ss:$8 sps:$4 sm:$0xff]  }
  0x3c   : > { %1994 = vmatmul.mubr.msk.bf16.gmra.mxu1 %vm255_vm1, %v2130_v57  ;;  %v1834_v57 = vld [vmem:[%s2316_s9 + $0xc4] sm:$0x1]  ;;  %v997_v60 = vrot.slane %v995_v52, 4  ;;  %v987_v0 = vor.u32 %v986_v55, %v983_v38  ;;  %v1012_v5 = vshll.u32 %v1833_v53, 16  ;;  %v1023_v7 = vshrl.u32 %v1835_v62, 16 }
  0x3d   : > { %2009 = vmatprep.mubr.msk.bf16.mxu1 %vm255_vm1, %v1838_v48  ;;  %v979_v58 = vsel %vm2358_vm4, %v974_v49, %v978_v35  ;;  %v1006_v4 = vrot.slane %v1004_v61, 5  ;;  %v1018_v6 = vshll.u32 %v1834_v57, 16  ;;  %v1026_v11 = vshll.u32 %v1835_v62, 16  ;;  %v2135_v29 = vld [vmem:[%s2316_s9 + $0x28] ss:$8 sps:$4 sm:$0xff]  }
  0x3e   : > { %2000 = vmatmul.mubr.msk.bf16.vlgmr.msra.gmra.mxu0 %vm255_vm1, %v2128_v3  ;;  %v1839_v63 = vcombine.low %v965_v54, %v979_v58  ;;  %v1009_v3 = vshrl.u32 %v1833_v53, 16  ;;  %v1014_v12 = vrot.slane %v1012_v5, 5  ;;  %v1025_v13 = vrot.slane %v1023_v7, 4  ;;  %v1880_v30 = vld [vmem:[%s2316_s9 + $0x8] sm:$0xf] }
  0x3f   : > { %2018 = vmatpush3.bf16.msra.mxu0 %v1182_v56  ;;  %2003 = vmatprep.mubr.msk.bf16.mxu0 %vm255_vm1, %v2131_v8  ;;  %v998_v56 = vshll.u32 %v1831_v41, 16  ;;  %v988_v8 = vrot.slane %v987_v0, 4  ;;  %v1032_v15 = vshll.u32 %v1836_v2, 16  ;;  %v1028_v19 = vrot.slane %v1026_v11, 5  ;;  %v2137_v32 = vld [vmem:[%s2316_s9 + $0x50] ss:$8 sps:$4 sm:$0xff]  }
  0x40   : > { %2058 = vmatprep.subr.msk.bf16.mxu0 %vm268_vm0, %v2432_v27  ;;  %v1011_v10 = vrot.slane %v1009_v3, 4  ;;  %v1020_v21 = vrot.slane %v1018_v6, 5  ;;  %v1531_v25 = vsel %vm268_vm0, %v2432_v27, 0  ;;  %v1881_v33 = vld [vmem:[%s2316_s9 + $0xc] sm:$0x1]  ;;  %v1393_v35 = vshrl.u32 %v1880_v30, 16 }
  0x41   : > { %v1000_v1 = vrot.slane %v998_v56, 5  ;;  %v993_v17 = vsel %vm2358_vm4, %v988_v8, %v992_v59  ;;  %v1029_v23 = vor.u32 %v1028_v19, %v1025_v13  ;;  %v1034_v24 = vrot.slane %v1032_v15, 5  ;;  %v1882_v34 = vld [vmem:[%s2316_s9 + $0x10] sm:$0xf]  ;;  %v1883_v37 = vld [vmem:[%s2316_s9 + $0x14] sm:$0x1] }
  0x42   : > { %v1015_v20 = vor.u32 %v1014_v12, %v1011_v10  ;;  %v1396_v39 = vshll.u32 %v1880_v30, 16  ;;  %v1402_v27 = vshll.u32 %v1881_v33, 16  ;;  %v1407_v40 = vshrl.u32 %v1882_v34, 16  ;;  %v1884_v45 = vld [vmem:[%s2316_s9 + $0x18] sm:$0xf] }
  0x43   : > { %v1001_v9 = vor.u32 %v1000_v1, %v997_v60  ;;  %v1410_v44 = vshll.u32 %v1882_v34, 16  ;;  %v1416_v14 = vshll.u32 %v1883_v37, 16  ;;  %v2136_v51 = vld [vmem:[%s2316_s9 + $0x38] ss:$8 sps:$4 sm:$0xff]   ;;  %v1887_v38 = vld [vmem:[%s2316_s9 + $0x24] sm:$0x1] }
  0x44   : > { %2010 = vmatmul.mubr.msk.bf16.vlgmr.msra.gmra.mxu1 %vm255_vm1, %v1839_v63  ;;  %v1016_v28 = vrot.slane %v1015_v20, 4  ;;  %v1398_v47 = vrot.slane %v1396_v39, 5  ;;  %v1404_v48 = vrot.slane %v1402_v27, 5  ;;  %v1409_v49 = vrot.slane %v1407_v40, 4  ;;  %v1886_v54 = vld [vmem:[%s2316_s9 + $0x20] sm:$0xf] }
  0x45   : > { %2028 = vmatpush3.bf16.msra.mxu1 %v1301_v31  ;;  %v1002_v18 = vrot.slane %v1001_v9, 4  ;;  %v1030_v31 = vrot.slane %v1029_v23, 4  ;;  %v1412_v52 = vrot.slane %v1410_v44, 5  ;;  %v1418_v53 = vrot.slane %v1416_v14, 5  ;;  %v2138_v63 = vld [vmem:[%s2316_s9 + $0x60] ss:$8 sps:$4 sm:$0xff]  }
  0x46   : > { %2004 = vmatmul.mubr.msk.bf16.gmra.mxu0 %vm255_vm1, %v2132_v42  ;;  %v1021_v36 = vsel %vm2358_vm4, %v1016_v28, %v1020_v21  ;;  %v1395_v42 = vrot.slane %v1393_v35, 4  ;;  %v1421_v56 = vshrl.u32 %v1884_v45, 16  ;;  %v1424_v57 = vshll.u32 %v1884_v45, 16  ;;  %v2139_v6 = vld [vmem:[%s2316_s9 + $0x70] ss:$8 sps:$4 sm:$0xff]  }
  0x47   : > { %2019 = vmatprep.mubr.msk.bf16.mxu0 %vm255_vm1, %v2133_v50  ;;  %v1007_v22 = vsel %vm2358_vm4, %v1002_v18, %v1006_v4  ;;  %v1035_v41 = vsel %vm2358_vm4, %v1030_v31, %v1034_v24  ;;  %v1885_v50 = vld [vmem:[%s2316_s9 + $0x1c] sm:$0x1]  ;;  %v1413_v59 = vor.u32 %v1412_v52, %v1409_v49  ;;  %v1435_v60 = vshrl.u32 %v1886_v54, 16  ;;  %v1888_v11 = vld [vmem:[%s2316_s9 + $0x28] sm:$0xf] }
  0x48   : > { %v1840_v26 = vcombine.low %v993_v17, %v1007_v22  ;;  %v1841_v46 = vcombine.low %v1021_v36, %v1035_v41  ;;  %v1399_v55 = vor.u32 %v1398_v47, %v1395_v42  ;;  %v1430_v58 = vshll.u32 %v1885_v50, 16  ;;  %v1889_v15 = vld [vmem:[%s2316_s9 + $0x2c] sm:$0x1]  ;;  %v1891_v17 = vld [vmem:[%s2316_s9 + $0x34] sm:$0x1] }
  0x49   : > { %v1438_v61 = vshll.u32 %v1886_v54, 16  ;;  %v1444_v62 = vshll.u32 %v1887_v38, 16  ;;  %v1423_v1 = vrot.slane %v1421_v56, 4  ;;  %v1426_v2 = vrot.slane %v1424_v57, 5  ;;  %v1892_v22 = vld [vmem:[%s2316_s9 + $0x38] sm:$0xf] }
  0x4a   : > { %2013 = vmatprep.mubr.msk.bf16.mxu1 %vm255_vm1, %v1840_v26  ;;  %v1400_v0 = vrot.slane %v1399_v55, 4  ;;  %v1414_v3 = vrot.slane %v1413_v59, 4  ;;  %v1437_v4 = vrot.slane %v1435_v60, 4  ;;  %v1432_v9 = vrot.slane %v1430_v58, 5  ;;  %v1893_v28 = vld [vmem:[%s2316_s9 + $0x3c] sm:$0x1] }
  0x4b   : > { %v1440_v5 = vrot.slane %v1438_v61, 5  ;;  %v1427_v8 = vor.u32 %v1426_v2, %v1423_v1  ;;  %v1446_v10 = vrot.slane %v1444_v62, 5  ;;  %v1449_v20 = vshrl.u32 %v1888_v11, 16  ;;  %v1894_v33 = vld [vmem:[%s2316_s9 + $0x40] sm:$0xf] }
  0x4c   : > { %2014 = vmatmul.mubr.msk.bf16.gmra.mxu1 %vm255_vm1, %v1841_v46  ;;  %v1405_v7 = vsel %vm2358_vm4, %v1400_v0, %v1404_v48  ;;  %v1419_v12 = vsel %vm2358_vm4, %v1414_v3, %v1418_v53  ;;  %v1452_v21 = vshll.u32 %v1888_v11, 16  ;;  %v1458_v24 = vshll.u32 %v1889_v15, 16  ;;  %v1895_v39 = vld [vmem:[%s2316_s9 + $0x44] sm:$0x1]  ;;  %v2140_v47 = vld [vmem:[%s2316_s9 + $0x80] ss:$8 sps:$4 sm:$0xff]  }
  0x4d   : > { %2029 = vmatprep.mubr.msk.bf16.mxu1 %vm255_vm1, %v2137_v32  ;;  %v1441_v13 = vor.u32 %v1440_v5, %v1437_v4  ;;  %v1897_v18 = vcombine.low %v1405_v7, %v1419_v12  ;;  %v1428_v19 = vrot.slane %v1427_v8, 4  ;;  %v1451_v30 = vrot.slane %v1449_v20, 4 }
  0x4e   : > { %2020 = vmatmul.mubr.msk.bf16.vlgmr.msra.gmra.mxu0 %vm255_vm1, %v2134_v16  ;;  %v1890_v16 = vld [vmem:[%s2316_s9 + $0x30] sm:$0xf]  ;;  %v1454_v31 = vrot.slane %v1452_v21, 5  ;;  %v1472_v32 = vshll.u32 %v1891_v17, 16  ;;  %v1460_v35 = vrot.slane %v1458_v24, 5  ;;  %v1477_v42 = vshrl.u32 %v1892_v22, 16 }
  0x4f   : > { %2038 = vmatpush3.bf16.msra.mxu0 %v1531_v25  ;;  %2023 = vmatprep.mubr.msk.bf16.mxu0 %vm255_vm1, %v2135_v29  ;;  %v1442_v23 = vrot.slane %v1441_v13, 4  ;;  %v1463_v25 = vshrl.u32 %v1890_v16, 16  ;;  %v1466_v26 = vshll.u32 %v1890_v16, 16  ;;  %v1433_v29 = vsel %vm2358_vm4, %v1428_v19, %v1432_v9  ;;  %s2544_s9 = scalar_lea.vmem [#allocation2], %s1751_s6 }
  0x50   : > { %v1455_v40 = vor.u32 %v1454_v31, %v1451_v30  ;;  %v1474_v41 = vrot.slane %v1472_v32, 5  ;;  %v1480_v14 = vshll.u32 %v1892_v22, 16  ;;  %v1486_v45 = vshll.u32 %v1893_v28, 16  ;;  %s1645_s11 = sshll.u32 %s2544_s9, 4  ;;  %s2565_s11 = int_to_ptr.vmem [resolvable:$true] %s1645_s11 }
  0x51   : > { %v1447_v34 = vsel %vm2358_vm4, %v1442_v23, %v1446_v10  ;;  %v1465_v36 = vrot.slane %v1463_v25, 4  ;;  %v1468_v37 = vrot.slane %v1466_v26, 5  ;;  %v1491_v46 = vshrl.u32 %v1894_v33, 16  ;;  %s2141_s23 = scalar_lea.vmem %s2565_s11, 1024  ;;  %p2148_p1 = scmp.lt.s32.totalorder %s2565_s11, %s2146_s27 }
  0x52   : > { %v1898_v27 = vcombine.low %v1433_v29, %v1447_v34  ;;  %v1456_v48 = vrot.slane %v1455_v40, 4  ;;  %v1479_v49 = vrot.slane %v1477_v42, 4  ;;  %v1494_v50 = vshll.u32 %v1894_v33, 16  ;;  %p2142_p12 = scmp.ne.s32.totalorder %s2565_s11, %s2141_s23  ;;  %p2149_p2 = scmp.lt.s32.totalorder %s2147_s28, %s2141_s23 }
  0x53   : > { %v1469_v44 = vor.u32 %v1468_v37, %v1465_v36  ;;  %v1482_v53 = vrot.slane %v1480_v14, 5  ;;  %v1493_v54 = vrot.slane %v1491_v46, 4  ;;  %v1488_v58 = vrot.slane %v1486_v45, 5 }
  0x54   : > { %2030 = vmatmul.mubr.msk.bf16.vlgmr.msra.gmra.mxu1 %vm255_vm1, %v2138_v63  ;;  %v1461_v38 = vsel %vm2358_vm4, %v1456_v48, %v1460_v35  ;;  %v1496_v55 = vrot.slane %v1494_v50, 5  ;;  %p2143_p13 = pnand %p2142_p12, %p2282_p4  ;;  %p2150_p3 = por %p2149_p2, %p2148_p1 }
  0x55   : > { %2033 = vmatprep.mubr.msk.bf16.mxu1 %vm255_vm1, %v2139_v6  ;;  %v1470_v52 = vrot.slane %v1469_v44, 4  ;;  %v1483_v57 = vor.u32 %v1482_v53, %v1479_v49 }
  0x56   : > { %2024 = vmatmul.mubr.msk.bf16.gmra.mxu0 %vm255_vm1, %v2136_v51  ;;  %v1500_v51 = vshll.u32 %v1895_v39, 16  ;;  %v1497_v60 = vor.u32 %v1496_v55, %v1493_v54  ;;  %p2144_p0 = pneg %p2143_p13 }
  0x57   : > { %2039 = vmatprep.mubr.msk.bf16.mxu0 %vm255_vm1, %v1897_v18  ;;  %v1475_v56 = vsel %vm2358_vm4, %v1470_v52, %v1474_v41  ;;  %v1484_v62 = vrot.slane %v1483_v57, 4 }
  0x58   : > { %v1899_v59 = vcombine.low %v1461_v38, %v1475_v56  ;;  %v1502_v61 = vrot.slane %v1500_v51, 5  ;;  %v1498_v63 = vrot.slane %v1497_v60, 4  ;;  %p2151_p5 = pnand %p2150_p3, %p2144_p0 }
  0x59   : > { %v1489_v0 = vsel %vm2358_vm4, %v1484_v62, %v1488_v58 }
  0x5a   : > { %v1503_v1 = vsel %vm2358_vm4, %v1498_v63, %v1502_v61 }
  0x5b   : > { %v1900_v2 = vcombine.low %v1489_v0, %v1503_v1 }
  0x5c   : > { %2034 = vmatmul.mubr.msk.bf16.gmra.mxu1 %vm255_vm1, %v2140_v47 }
  0x5e   : > { %2040 = vmatmul.mubr.msk.bf16.vlgmr.msra.gmra.mxu0 %vm255_vm1, %v1898_v27 }
  0x5f   : > { %2043 = vmatprep.mubr.msk.bf16.mxu0 %vm255_vm1, %v1899_v59 }
  0x66   : > { %2044 = vmatmul.mubr.msk.bf16.gmra.mxu0 %vm255_vm1, %v1900_v2 }
  0xdb   : > { %v1961_v5 = vpop.f32.mrf.mxu0 }
  0xdc   : > { %v1965_v3 = vpop.f32.mrf.mxu1 }
  0xdd   : > { %v306_v8 = vpop.f32.mrf.mxu0 }
  0xde   : > { %v322_v4 = vpop.f32.mrf.mxu1 }
  0xdf   : > { %v1962_v11 = vpop.f32.mrf.mxu0 }
  0xe0   : > { %v2523_v6 = vpop.f32.mrf.mxu1 }
  0xe1   : > { %v309_v15 = vpop.f32.mrf.mxu0 }
  0xe2   : > { %v2525_v7 = vpop.f32.mrf.mxu1 }
  0xe4   : > { %v1971_v9 = vpop.f32.mrf.mxu1 }
  0xe5   : > { %v415_v14 = vadd.f32 %v1971_v9, %v1961_v5 }
  0xe6   : > { %v406_v10 = vpop.f32.mrf.mxu1 }
  0xe7   : > { %v407_v47 = vadd.f32 %v406_v10, %v306_v8 }
  0xe8   : > { %v1972_v12 = vpop.f32.mrf.mxu1 }
  0xe9   : > { %v418_v50 = vadd.f32 %v1972_v12, %v1962_v11 }
  0xea   : > { %v409_v13 = vpop.f32.mrf.mxu1 }
  0xeb   : > { %v410_v54 = vadd.f32 %v409_v13, %v309_v15 }
  0xec   : > { %v1975_v16 = vpop.f32.mrf.mxu1  ;;  %v1981_v43 = vpop.f32.mrf.mxu0 }
  0xed   : > { %v664_v49 = vadd.f32 %v1981_v43, %v415_v14  ;;  %v431_v61 = vadd.f32 %v1975_v16, %v1965_v3 }
  0xee   : > { %v422_v17 = vpop.f32.mrf.mxu1  ;;  %v631_v18 = vpop.f32.mrf.mxu0 }
  0xef   : > { %v662_v53 = vadd.f32 %v631_v18, %v407_v47  ;;  %v423_v1 = vadd.f32 %v422_v17, %v322_v4 }
  0xf0   : > { %v1976_v19 = vpop.f32.mrf.mxu1  ;;  %v1982_v20 = vpop.f32.mrf.mxu0 }
  0xf1   : > { %v665_v56 = vadd.f32 %v1982_v20, %v418_v50  ;;  %v434_v11 = vadd.f32 %v1976_v19, %v2523_v6 }
  0xf2   : > { %v425_v21 = vpop.f32.mrf.mxu1  ;;  %v634_v22 = vpop.f32.mrf.mxu0 }
  0xf3   : > { %v663_v60 = vadd.f32 %v634_v22, %v410_v54  ;;  %v426_v3 = vadd.f32 %v425_v21, %v2525_v7 }
  0xf4   : > { %v1991_v23 = vpop.f32.mrf.mxu1 }
  0xf5   : > { %v783_v38 = vadd.f32 %v1991_v23, %v664_v49 }
  0xf6   : > { %v750_v24 = vpop.f32.mrf.mxu1  ;;  %v1985_v25 = vpop.f32.mrf.mxu0 }
  0xf7   : > { %v781_v57 = vadd.f32 %v750_v24, %v662_v53  ;;  %v668_v13 = vadd.f32 %v1985_v25, %v431_v61 }
  0xf8   : > { %v1992_v26 = vpop.f32.mrf.mxu1  ;;  %v647_v28 = vpop.f32.mrf.mxu0 }
  0xf9   : > { %v784_v63 = vadd.f32 %v1992_v26, %v665_v56  ;;  %v666_v20 = vadd.f32 %v647_v28, %v423_v1 }
  0xfa   : > { %v753_v29 = vpop.f32.mrf.mxu1  ;;  %v1986_v30 = vpop.f32.mrf.mxu0 }
  0xfb   : > { %v782_v8 = vadd.f32 %v753_v29, %v663_v60  ;;  %v669_v26 = vadd.f32 %v1986_v30, %v434_v11 }
  0xfc   : > { %v1995_v31 = vpop.f32.mrf.mxu1  ;;  %v650_v32 = vpop.f32.mrf.mxu0 }
  0xfd   : > { %v787_v23 = vadd.f32 %v1995_v31, %v668_v13 }
  0xfe   : > { %v766_v33 = vpop.f32.mrf.mxu1  ;;  %v2001_v34 = vpop.f32.mrf.mxu0 }
  0xff   : > { %v902_v62 = vadd.f32 %v2001_v34, %v783_v38  ;;  %v785_v29 = vadd.f32 %v766_v33, %v666_v20  ;;  %v1905_v33 = vld [vmem:[%s2620_s2] ss:$0 sm:$0xff] }
 0x100   : > { %v1996_v35 = vpop.f32.mrf.mxu1  ;;  %v869_v36 = vpop.f32.mrf.mxu0 }
 0x101   : > { %v900_v5 = vadd.f32 %v869_v36, %v781_v57 }
 0x102   : > { %v2002_v37 = vpop.f32.mrf.mxu0  ;;  %v2527_v39 = vpop.f32.mrf.mxu1 }
 0x103   : > { %v903_v15 = vadd.f32 %v2002_v37, %v784_v63  ;;  %v667_v37 = vadd.f32 %v650_v32, %v426_v3 }
 0x104   : > { %v872_v27 = vpop.f32.mrf.mxu0  ;;  %v2011_v41 = vpop.f32.mrf.mxu1 }
 0x105   : > { %v1132_v9 = vadd.f32 %v2011_v41, %v902_v62  ;;  %v901_v22 = vadd.f32 %v872_v27, %v782_v8  ;;  %v788_v41 = vadd.f32 %v1996_v35, %v669_v26  ;;  %v786_v14 = vadd.f32 %v2527_v39, %v667_v37 }
 0x106   : > { %v2005_v40 = vpop.f32.mrf.mxu0  ;;  %v1099_v44 = vpop.f32.mrf.mxu1 }
 0x107   : > { %v1130_v43 = vadd.f32 %v1099_v44, %v900_v5  ;;  %v906_v44 = vadd.f32 %v2005_v40, %v787_v23 }
 0x108   : > { %v885_v42 = vpop.f32.mrf.mxu0  ;;  %v2012_v46 = vpop.f32.mrf.mxu1 }
 0x109   : > { %v1133_v17 = vadd.f32 %v2012_v46, %v903_v15  ;;  %v904_v27 = vadd.f32 %v885_v42, %v785_v29 }
 0x10a   : > { %v2529_v45 = vpop.f32.mrf.mxu0  ;;  %v1102_v51 = vpop.f32.mrf.mxu1 }
 0x10b   : > { %v1131_v19 = vadd.f32 %v1102_v51, %v901_v22  ;;  %v907_v40 = vadd.f32 %v2529_v45, %v788_v41 }
 0x10c   : > { %v2531_v48 = vpop.f32.mrf.mxu0  ;;  %v2015_v58 = vpop.f32.mrf.mxu1 }
 0x10d   : > { %v1136_v47 = vadd.f32 %v2015_v58, %v906_v44  ;;  %v905_v39 = vadd.f32 %v2531_v48, %v786_v14 }
 0x10e   : > { %v2021_v52 = vpop.f32.mrf.mxu0  ;;  %v1115_v0 = vpop.f32.mrf.mxu1 }
 0x10f   : > { %v1251_v4 = vadd.f32 %v2021_v52, %v1132_v9  ;;  %v1134_v51 = vadd.f32 %v1115_v0, %v904_v27 }
 0x110   : > { %v1218_v55 = vpop.f32.mrf.mxu0  ;;  %v2016_v10 = vpop.f32.mrf.mxu1 }
 0x111   : > { %v1249_v6 = vadd.f32 %v1218_v55, %v1130_v43  ;;  %v1137_v56 = vadd.f32 %v2016_v10, %v907_v40 }
 0x112   : > { %v2022_v59 = vpop.f32.mrf.mxu0  ;;  %v1118_v18 = vpop.f32.mrf.mxu1 }
 0x113   : > { %v1252_v7 = vadd.f32 %v2022_v59, %v1133_v17  ;;  %v1135_v59 = vadd.f32 %v1118_v18, %v905_v39 }
 0x114   : > { %v1221_v2 = vpop.f32.mrf.mxu0  ;;  %v2031_v24 = vpop.f32.mrf.mxu1 }
 0x115   : > { %v1370_v25 = vadd.f32 %v2031_v24, %v1251_v4  ;;  %v1250_v46 = vadd.f32 %v1221_v2, %v1131_v19 }
 0x116   : > { %v2025_v12 = vpop.f32.mrf.mxu0  ;;  %v1337_v36 = vpop.f32.mrf.mxu1 }
 0x117   : > { %v1368_v21 = vadd.f32 %v1337_v36, %v1249_v6  ;;  %v1255_v55 = vadd.f32 %v2025_v12, %v1136_v47 }
 0x118   : > { %v1234_v16 = vpop.f32.mrf.mxu0  ;;  %v2032_v31 = vpop.f32.mrf.mxu1 }
 0x119   : > { %v1371_v32 = vadd.f32 %v2032_v31, %v1252_v7  ;;  %v1253_v61 = vadd.f32 %v1234_v16, %v1134_v51 }
 0x11a   : > { %v2026_v34 = vpop.f32.mrf.mxu0  ;;  %v1340_v35 = vpop.f32.mrf.mxu1 }
 0x11b   : > { %v1369_v42 = vadd.f32 %v1340_v35, %v1250_v46  ;;  %v1256_v1 = vadd.f32 %v2026_v34, %v1137_v56 }
 0x11c   : > { %v1237_v28 = vpop.f32.mrf.mxu0  ;;  %v2035_v54 = vpop.f32.mrf.mxu1 }
 0x11d   : > { %v1374_v63 = vadd.f32 %v2035_v54, %v1255_v55  ;;  %v1254_v10 = vadd.f32 %v1237_v28, %v1135_v59 }
 0x11e   : > { %v2041_v30 = vpop.f32.mrf.mxu0  ;;  %v1353_v58 = vpop.f32.mrf.mxu1 }
 0x11f   : > { %v1600_v49 = vadd.f32 %v2041_v30, %v1370_v25  ;;  %v1372_v5 = vadd.f32 %v1353_v58, %v1253_v61 }
 0x120   : > { %v1567_v50 = vpop.f32.mrf.mxu0  ;;  %v2036_v0 = vpop.f32.mrf.mxu1 }
 0x121   : > { %v1615_v52 = vadd.f32 %v1905_v33, %v1600_v49  ;;  %v1598_v53 = vadd.f32 %v1567_v50, %v1368_v21  ;;  %v1375_v12 = vadd.f32 %v2036_v0, %v1256_v1 }
 0x122   : > { %v2042_v38 = vpop.f32.mrf.mxu0  ;;  %v1356_v9 = vpop.f32.mrf.mxu1 }
 0x123   : > { %1624 = vst.msk [vmem:[%s2544_s9 + $0x10] sm:$0xff] %vm1621_vm5, %v1615_v52  ;;  %v1613_v45 = vadd.f32 %v1905_v33, %v1598_v53  ;;  %v1601_v57 = vadd.f32 %v2042_v38, %v1371_v32  ;;  %v1373_v18 = vadd.f32 %v1356_v9, %v1254_v10 }
 0x124   : > { %v1570_v60 = vpop.f32.mrf.mxu0 }
 0x125   : > { %1622 = vst.msk [vmem:[%s2544_s9] sm:$0xff] %vm1621_vm5, %v1613_v45  ;;  %v1616_v48 = vadd.f32 %v1905_v33, %v1601_v57  ;;  %v1599_v62 = vadd.f32 %v1570_v60, %v1369_v42 }
 0x126   : > { %v2045_v8 = vpop.f32.mrf.mxu0 }
 0x127   : > { %1625 = vst.msk [vmem:[%s2544_s9 + $0x18] sm:$0xff] %vm1621_vm5, %v1616_v48  ;;  %v1614_v2 = vadd.f32 %v1905_v33, %v1599_v62  ;;  %v1604_v11 = vadd.f32 %v2045_v8, %v1374_v63 }
 0x128   : > { %v1583_v13 = vpop.f32.mrf.mxu0 }
 0x129   : > { %1623 = vst.msk [vmem:[%s2544_s9 + $0x8] sm:$0xff] %vm1621_vm5, %v1614_v2  ;;  %v1619_v15 = vadd.f32 %v1905_v33, %v1604_v11  ;;  %v1602_v43 = vadd.f32 %v1583_v13, %v1372_v5 }
 0x12a   : > { %v2046_v20 = vpop.f32.mrf.mxu0 }
 0x12b   : > { %1628 = vst.msk [vmem:[%s2544_s9 + $0x30] sm:$0xff] %vm1621_vm5, %v1619_v15  ;;  %v1617_v3 = vadd.f32 %v1905_v33, %v1602_v43  ;;  %v1605_v16 = vadd.f32 %v2046_v20, %v1375_v12 }
 0x12c   : > { %v1586_v22 = vpop.f32.mrf.mxu0 }
 0x12d   : > { %1626 = vst.msk [vmem:[%s2544_s9 + $0x20] sm:$0xff] %vm1621_vm5, %v1617_v3  ;;  %v1620_v23 = vadd.f32 %v1905_v33, %v1605_v16  ;;  %v1603_v4 = vadd.f32 %v1586_v22, %v1373_v18 }
 0x12f   : > { %1629 = vst.msk [vmem:[%s2544_s9 + $0x38] sm:$0xff] %vm1621_vm5, %v1620_v23  ;;  %v1618_v17 = vadd.f32 %v1905_v33, %v1603_v4 }
 0x131   : > { %1627 = vst.msk [vmem:[%s2544_s9 + $0x28] sm:$0xff] %vm1621_vm5, %v1618_v17 }
 0x132   : > { %2154 = shalt.err (!%p2151_p5)
}
 0x133   : > { %s2155_s29 = scalar_lea.hbm %s2563_s21, 1024  ;;  %s2159_s5 = scalar_lea.hbm %s2621_s3, 2048 }
 0x134   : > { %p2156_p6 = scmp.ne.s32.totalorder %s2563_s21, %s2155_s29  ;;  %p2160_p10 = scmp.lt.s32.totalorder %s2563_s21, %s2621_s3 }
 0x135   : > { %p2161_p11 = scmp.lt.s32.totalorder %s2159_s5, %s2155_s29 }
 0x136   : > { %p2157_p7 = pnand %p2156_p6, %p2282_p4 }
 0x137   : > { %p2162_p12 = por %p2161_p11, %p2160_p10 }
 0x138   : > { %p2158_p9 = pneg %p2157_p7 }
 0x13a   : > { %p2163_p13 = pnand %p2162_p12, %p2158_p9 }
 0x13c   : > { %2166 = shalt.err (!%p2163_p13)
}
 0x13d   : > { %s2220_s8 = smov 128   ;;  %s2221_s9 = smov 8  }
 0x13e   : > { %2060 = dma.vmem_to_hbm [thread:$0]  (%p2282_p4), %s2565_s11, 1024, %s2563_s21, %s2573_s15, %s2220_s8, %s2220_s8, %s2221_s9  }
 0x13f PF: > { %p2066_p0 = scmp.ge.s32.totalorder %s2217_s17, 2  ;;  %s1660_s10 = sand.u32 1, %s2197_s12  }
 0x140   : > { %s1661_s18 = scalar_lea.sflag [#allocation3], %s1660_s10 }
 0x141   : > { %p2063_p1 = pnand %p2066_p0, %p2289_p8 }
 0x143   : > { %p2064_p2 = pneg %p2063_p1 }
 0x145   : > { %2192 = dma.done.wait (%p2064_p2), %s1661_s18, 1024  }
 0x146   : > { %2194 = vsyncadd (%p2064_p2), %s1661_s18, 4294966272  ;;  %s16_s17 = sadd.s32 1, %s2217_s17   ;;  %s2626_s12 = smov %s2201_s13 }
 0x147   : > { %p13_p3 = scmp.ge.s32.totalorder %s16_s17, 4   ;;  %s2627_s13 = smov %s2205_s14 }
 0x148   : > { %s2628_s14 = smov %s2295_s25  ;;  %s2629_s15 = smov %s2213_s16 }
 0x149   : > { %s2630_s16 = smov %s2632_s20  ;;  %15 = sbr.rel (!%p13_p3) target bundleno = 4 (0x4), region = 86 }
 0x14e   :  { %1666 = vsyncpa [#allocation3], 1 }
 0x14f   :  { %1668 = vsyncpa [#allocation3 + $0x1], 1 }

</bundles_post_ra>
